<compile_context>
chip_gen: v6e
topology: v6e:2x2x1
jax: 0.10.0
libtpu: 0.0.40
codegen_flags: <defaults>
</compile_context>

<pallas_src>
import math

import jax
import jax.numpy as jnp
from jax.experimental import pallas as pl
from jax.experimental.pallas import tpu as pltpu

_MAX_BLOCK_BYTES = 2 * 1024 * 1024  # per-block footprint target (one buffer)


def _h_sigmoid_kernel(x_ref, o_ref):
    x = x_ref[...]
    # relu6(x + 3) / 6 == clip(x + 3, 0, 6) * (1/6); stays in input dtype.
    o_ref[...] = (jnp.clip(x + 3.0, 0.0, 6.0) * (1.0 / 6.0)).astype(o_ref.dtype)


def _round_up(v: int, m: int) -> int:
    return ((v + m - 1) // m) * m


def _sublane_multiple(dtype) -> int:
    # Native second-minor packing: f32 -> 8, bf16/f16 -> 16, int8/fp8 -> 32.
    itemsize = jnp.dtype(dtype).itemsize
    return 8 * max(1, 4 // max(1, itemsize))


@jax.jit
def h_sigmoid(x: jax.Array) -> jax.Array:
    """Elementwise hard-sigmoid: relu6(x + 3) / 6. Accepts any input shape."""
    orig_shape = x.shape
    total = math.prod(orig_shape) if orig_shape else 1
    if total == 0:
        return x
    itemsize = jnp.dtype(x.dtype).itemsize
    sub = _sublane_multiple(x.dtype)

    # Pick the widest lane count that divides the element count exactly
    # (avoids a padding copy in the wrapper); otherwise pad to 1024 lanes.
    lanes = None
    for cand in (1024, 512, 256, 128):
        if total % cand == 0:
            lanes = cand
            break
    if lanes is None:
        lanes = 1024

    rows = pl.cdiv(total, lanes)

    # Block rows: multiple of the sublane packing, capped at ~2 MiB per block.
    max_block_rows = max(sub, _MAX_BLOCK_BYTES // (lanes * itemsize))
    max_block_rows = (max_block_rows // sub) * sub
    if rows <= max_block_rows:
        block_rows = _round_up(rows, sub)
    else:
        block_rows = max_block_rows

    rows_padded = _round_up(rows, block_rows)
    padded_total = rows_padded * lanes

    flat = x.reshape(-1)
    if padded_total != total:
        flat = jnp.pad(flat, (0, padded_total - total))
    x2d = flat.reshape(rows_padded, lanes)

    grid = (rows_padded // block_rows,)
    out2d = pl.pallas_call(
        _h_sigmoid_kernel,
        out_shape=jax.ShapeDtypeStruct((rows_padded, lanes), x.dtype),
        grid=grid,
        in_specs=[pl.BlockSpec((block_rows, lanes), lambda i: (i, 0))],
        out_specs=pl.BlockSpec((block_rows, lanes), lambda i: (i, 0)),
        compiler_params=pltpu.CompilerParams(
            dimension_semantics=("parallel",),
        ),
        cost_estimate=pl.CostEstimate(
            flops=3 * padded_total,
            transcendentals=0,
            bytes_accessed=2 * padded_total * itemsize,
        ),
    )(x2d)

    out_flat = out2d.reshape(-1)
    if padded_total != total:
        out_flat = out_flat[:total]
    return out_flat.reshape(orig_shape)


if __name__ == "__main__":
    key = jax.random.PRNGKey(0)
    # Small NCHW input consistent with a typical conv feature map.
    x = jax.random.normal(key, (2, 4, 16, 16), dtype=jnp.float32) * 4.0

    y = h_sigmoid(x)
    y = jax.block_until_ready(y)

    # Reference check against plain JAX.
    y_ref = jnp.clip(x + 3.0, 0.0, 6.0) / 6.0
    assert y.shape == x.shape
    assert y.dtype == x.dtype
    assert jnp.allclose(y, y_ref, atol=1e-6), "mismatch vs reference"

    # Also exercise a shape whose element count is NOT a multiple of 1024
    # (forces the padded path), to make sure both paths are correct.
    x2 = jax.random.normal(jax.random.PRNGKey(1), (2, 4, 7, 7), dtype=jnp.float32) * 4.0
    y2 = jax.block_until_ready(h_sigmoid(x2))
    y2_ref = jnp.clip(x2 + 3.0, 0.0, 6.0) / 6.0
    assert jnp.allclose(y2, y2_ref, atol=1e-6), "mismatch vs reference (padded path)"

    print("KERNEL_OK")
</pallas_src>

<mosaic_0001>
module attributes {stable_mosaic.version = 11 : i64} {
  func.func @_h_sigmoid_kernel(%arg0: i32, %arg1: memref<8x1024xf32, #tpu.memory_space<vmem>>, %arg2: memref<8x1024xf32, #tpu.memory_space<vmem>>) attributes {dimension_semantics = [#tpu.dimension_semantics<parallel>], iteration_bounds = array<i64: 1>, scalar_prefetch = 0 : i64, scratch_operands = 0 : i64, tpu.core_type = #tpu.core_type<tc>, window_params = [{transform_indices = @transform_0, window_bounds = array<i64: 8, 1024>}, {transform_indices = @transform_1, window_bounds = array<i64: 8, 1024>}]} {
    %c0 = arith.constant 0 : index
    %c0_0 = arith.constant 0 : index
    %0 = vector.load %arg1[%c0, %c0_0] : memref<8x1024xf32, #tpu.memory_space<vmem>>, vector<8x1024xf32>
    %cst = arith.constant 3.000000e+00 : f32
    %1 = vector.broadcast %cst : f32 to vector<8x1024xf32>
    %2 = arith.addf %0, %1 : vector<8x1024xf32>
    %cst_1 = arith.constant 0.000000e+00 : f32
    %cst_2 = arith.constant 6.000000e+00 : f32
    %3 = vector.broadcast %cst_1 : f32 to vector<8x1024xf32>
    %4 = arith.maximumf %3, %2 : vector<8x1024xf32>
    %5 = vector.broadcast %cst_2 : f32 to vector<8x1024xf32>
    %6 = arith.minimumf %5, %4 : vector<8x1024xf32>
    %cst_3 = arith.constant 0.166666672 : f32
    %7 = vector.broadcast %cst_3 : f32 to vector<8x1024xf32>
    %8 = arith.mulf %6, %7 : vector<8x1024xf32>
    %c0_4 = arith.constant 0 : index
    %c0_5 = arith.constant 0 : index
    %9 = vector.load %arg2[%c0_4, %c0_5] : memref<8x1024xf32, #tpu.memory_space<vmem>>, vector<8x1024xf32>
    tpu.vector_store %arg2[%c0_4, %c0_5], %8 {strides = array<i32>} : memref<8x1024xf32, #tpu.memory_space<vmem>>, vector<8x1024xf32>,
    return
  }
  func.func @transform_0(%arg0: i32) -> (i32, i32) {
    %c0_i32 = arith.constant 0 : i32
    %c0_i32_0 = arith.constant 0 : i32
    return %arg0, %c0_i32 : i32, i32
  }
  func.func @transform_1(%arg0: i32) -> (i32, i32) {
    %c0_i32 = arith.constant 0 : i32
    %c0_i32_0 = arith.constant 0 : i32
    return %arg0, %c0_i32 : i32, i32
  }
}

</mosaic_0001>

<bundles_post_ra>
// kernel: h_sigmoid.1
= control target key start
LH: loop header
LB: loop body
LE: loop exit
PB: predicated region body
PF: predicated region fallthrough
CT: control target
= control target key end

     0   :  { %s118_s0 = inlined_call_operand.vmem [shape: f32[8,1024], index: 0, kind: input, shape index: {}]   ;;  %s119_s1 = inlined_call_operand.vmem [shape: f32[8,1024], index: 1, kind: output, shape index: {}]  }
   0x1   :  { %v8_v0 = vld [vmem:[%s118_s0] sm:$0xff]  ;;  %v9_v1 = vld [vmem:[%s118_s0 + $0x8] sm:$0xff]  ;;  %v10_v2 = vld [vmem:[%s118_s0 + $0x10] sm:$0xff] }
   0x2   :  { %v16_v3 = vadd.f32 3.0, %v8_v0  ;;  %v17_v4 = vadd.f32 3.0, %v9_v1  ;;  %v18_v5 = vadd.f32 3.0, %v10_v2  ;;  %v11_v6 = vld [vmem:[%s118_s0 + $0x18] sm:$0xff]  ;;  %v12_v7 = vld [vmem:[%s118_s0 + $0x20] sm:$0xff]  ;;  %v13_v8 = vld [vmem:[%s118_s0 + $0x28] sm:$0xff] }
   0x3   :  { %v19_v9 = vadd.f32 3.0, %v11_v6  ;;  %v20_v10 = vadd.f32 3.0, %v12_v7  ;;  %v21_v11 = vadd.f32 3.0, %v13_v8  ;;  %v14_v12 = vld [vmem:[%s118_s0 + $0x30] sm:$0xff]  ;;  %v15_v13 = vld [vmem:[%s118_s0 + $0x38] sm:$0xff] }
   0x4   :  { %v24_v14 = vmax.f32 %v16_v3, 0.0  ;;  %v25_v15 = vmax.f32 %v17_v4, 0.0  ;;  %v26_v16 = vmax.f32 %v18_v5, 0.0  ;;  %v22_v17 = vadd.f32 3.0, %v14_v12 }
   0x5   :  { %v27_v18 = vmax.f32 %v19_v9, 0.0  ;;  %v28_v19 = vmax.f32 %v20_v10, 0.0  ;;  %v29_v20 = vmax.f32 %v21_v11, 0.0  ;;  %v23_v21 = vadd.f32 3.0, %v15_v13 }
   0x6   :  { %v32_v22 = vmin.f32 %v24_v14, 6.0  ;;  %v33_v23 = vmin.f32 %v25_v15, 6.0  ;;  %v34_v24 = vmin.f32 %v26_v16, 6.0  ;;  %v30_v25 = vmax.f32 %v22_v17, 0.0 }
   0x7   :  { %v35_v26 = vmin.f32 %v27_v18, 6.0  ;;  %v36_v27 = vmin.f32 %v28_v19, 6.0  ;;  %v37_v28 = vmin.f32 %v29_v20, 6.0  ;;  %v31_v29 = vmax.f32 %v23_v21, 0.0 }
   0x8   :  { %v40_v30 = vmul.f32 0.16666667, %v32_v22  ;;  %v41_v31 = vmul.f32 0.16666667, %v33_v23  ;;  %v42_v32 = vmul.f32 0.16666667, %v34_v24 }
   0x9   :  { %v43_v33 = vmul.f32 0.16666667, %v35_v26  ;;  %v44_v34 = vmul.f32 0.16666667, %v36_v27  ;;  %v45_v35 = vmul.f32 0.16666667, %v37_v28 }
   0xa   :  { %48 = vst [vmem:[%s119_s1] sm:$0xff] %v40_v30  ;;  %49 = vst [vmem:[%s119_s1 + $0x8] sm:$0xff] %v41_v31  ;;  %v38_v36 = vmin.f32 %v30_v25, 6.0  ;;  %v39_v37 = vmin.f32 %v31_v29, 6.0 }
   0xb   :  { %50 = vst [vmem:[%s119_s1 + $0x10] sm:$0xff] %v42_v32  ;;  %51 = vst [vmem:[%s119_s1 + $0x18] sm:$0xff] %v43_v33 }
   0xc   :  { %52 = vst [vmem:[%s119_s1 + $0x20] sm:$0xff] %v44_v34  ;;  %53 = vst [vmem:[%s119_s1 + $0x28] sm:$0xff] %v45_v35  ;;  %v46_v38 = vmul.f32 0.16666667, %v38_v36  ;;  %v47_v39 = vmul.f32 0.16666667, %v39_v37 }
   0xe   :  { %54 = vst [vmem:[%s119_s1 + $0x30] sm:$0xff] %v46_v38  ;;  %55 = vst [vmem:[%s119_s1 + $0x38] sm:$0xff] %v47_v39 }

</bundles_post_ra>
